<compile_context>
chip_gen: v5e
topology: v5e:2x2
jax: 0.10.0
libtpu: 0.0.40
codegen_flags: <defaults>
</compile_context>

<pallas_src>
import math

import jax
import jax.numpy as jnp
from jax.experimental import pallas as pl
from jax.experimental.pallas import tpu as pltpu

SQRT2 = math.sqrt(2.0)


def _round_up(a: int, b: int) -> int:
    return ((a + b - 1) // b) * b


# ----------------------------------------------------------------------------- kernel
def radon_matmul_kernel(x_ref, b_ref, o_ref, acc_ref):
    """out[nc, (l, j)] = sum_k x[nc, k] * B[k, (l, j)],  k = p*W + q.

    grid = (column blocks over (angle, detector) pairs  [parallel],
            contraction blocks over k                   [arbitrary, reduction last])
    """
    @pl.when(pl.program_id(1) == 0)
    def _init():
        acc_ref[...] = jnp.zeros_like(acc_ref)

    acc_ref[...] += jnp.dot(x_ref[...], b_ref[...],
                            preferred_element_type=jnp.float32)

    @pl.when(pl.program_id(1) == pl.num_programs(1) - 1)
    def _finalize():
        o_ref[...] = acc_ref[...].astype(o_ref.dtype)


# ---------------------------------------------------------------- operator (constants)
def _projection_operator(theta_deg, W):
    """Input-independent Radon projection operator, laid out as (K, L*W) with
    K = p*W + q rows and (l*W + j) columns.  Mirrors _create_grids (affine_grid with
    R = [[c, s, 0], [-s, c, 0]], align_corners=True) plus the bilinear interpolation
    weights of grid_sample (zero padding) pre-contracted over the rotated-row index i."""
    rad = theta_deg * (math.pi / 180.0)
    c = jnp.cos(rad).astype(jnp.float32)                     # (L,)
    s = jnp.sin(rad).astype(jnp.float32)

    lin = jnp.linspace(-1.0, 1.0, W, dtype=jnp.float32)
    xb = lin[None, None, :]                                  # varies with j
    yb = lin[None, :, None]                                  # varies with i
    gx = c[:, None, None] * xb + s[:, None, None] * yb       # (L, W_i, W_j)
    gy = -s[:, None, None] * xb + c[:, None, None] * yb

    half = 0.5 * (W - 1)
    ixp = (gx + 1.0) * half                                  # pixel-space column coord
    iyp = (gy + 1.0) * half                                  # pixel-space row coord

    taps = jnp.arange(W, dtype=jnp.float32)
    wy = jnp.maximum(0.0, 1.0 - jnp.abs(iyp[..., None] - taps))   # (L, Wi, Wj, Wp)
    wx = jnp.maximum(0.0, 1.0 - jnp.abs(ixp[..., None] - taps))   # (L, Wi, Wj, Wq)

    # B[l, j, p, q] = sum_i wy[l,i,j,p] * wx[l,i,j,q]
    # (explicit f32 multiply + sum: no reliance on default TPU matmul precision)
    B = jnp.sum(wy[:, :, :, :, None] * wx[:, :, :, None, :], axis=1)  # (L, Wj, Wp, Wq)

    # -> (K, L*W):   rows = p*W + q,   cols = l*W + j
    return jnp.transpose(B, (2, 3, 0, 1)).reshape(W * W, -1)


# ---------------------------------------------------------------------------- wrapper
def radon_forward(x, theta_deg=None, circle=True, *, col_block=512, k_block=1024):
    """JAX/Pallas equivalent of pytorch_radon.Radon(in_size, theta, circle)(x)."""
    x = x.astype(jnp.float32)
    N, C, H, W0 = x.shape
    assert H == W0
    if theta_deg is None:
        theta_deg = jnp.arange(180, dtype=jnp.float32)
    theta_deg = jnp.asarray(theta_deg, dtype=jnp.float32)

    if not circle:
        diagonal = SQRT2 * W0
        pad = int(math.ceil(diagonal - W0))
        new_center = (W0 + pad) // 2
        old_center = W0 // 2
        pad_before = new_center - old_center
        x = jnp.pad(x, ((0, 0), (0, 0),
                        (pad_before, pad - pad_before),
                        (pad_before, pad - pad_before)))

    W = x.shape[-1]
    NC = N * C
    L = int(theta_deg.shape[0])
    K = W * W
    LW = L * W

    # constant (input-independent) projection operator
    Bc = _projection_operator(theta_deg, W)                   # (K, L*W)

    # tile sizes: lane-dense multiples of 128 on both the column and contraction axes
    tk = min(k_block, _round_up(K, 128))
    K_pad = _round_up(K, tk)
    tn = min(col_block, _round_up(LW, 128))
    LW_pad = _round_up(LW, tn)

    x_flat = x.reshape(NC, K)                                 # [n*C+c, p*W+q]
    x_flat = jnp.pad(x_flat, ((0, 0), (0, K_pad - K)))
    Bc = jnp.pad(Bc, ((0, K_pad - K), (0, LW_pad - LW)))

    grid = (LW_pad // tn, K_pad // tk)                        # (6, 1) for the test case

    out_t = pl.pallas_call(
        radon_matmul_kernel,
        out_shape=jax.ShapeDtypeStruct((NC, LW_pad), jnp.float32),
        grid_spec=pltpu.PrefetchScalarGridSpec(
            num_scalar_prefetch=0,
            grid=grid,
            in_specs=[
                # flattened image: VMEM-resident across column blocks
                pl.BlockSpec((NC, tk), lambda j, k: (0, k)),
                # operator columns (32 angles x W detectors per block), streamed
                pl.BlockSpec((tk, tn), lambda j, k: (k, j)),
            ],
            out_specs=pl.BlockSpec((NC, tn), lambda j, k: (0, j)),
            scratch_shapes=[pltpu.VMEM((NC, tn), jnp.float32)],
        ),
        compiler_params=pltpu.CompilerParams(
            dimension_semantics=("parallel", "arbitrary")),
    )(x_flat, Bc)

    # out_t[nc, l*W + j]  ->  (N, C, W, L)
    out = out_t[:, :LW].reshape(N, C, L, W)
    return jnp.transpose(out, (0, 1, 3, 2))


# -------------------------------------------------------------------- pure-JAX reference
def radon_reference(x, theta_deg):
    """Gather-based reference mirroring F.affine_grid + F.grid_sample semantics."""
    x = x.astype(jnp.float32)
    N, C, H, W = x.shape
    rad = theta_deg * (math.pi / 180.0)
    c = jnp.cos(rad)
    s = jnp.sin(rad)
    lin = jnp.linspace(-1.0, 1.0, W)
    xb, yb = jnp.meshgrid(lin, lin, indexing="xy")            # xb[i,j]=lin[j], yb[i,j]=lin[i]
    gx = c[:, None, None] * xb[None] + s[:, None, None] * yb[None]
    gy = -s[:, None, None] * xb[None] + c[:, None, None] * yb[None]
    ix = (gx + 1.0) * 0.5 * (W - 1)
    iy = (gy + 1.0) * 0.5 * (W - 1)
    ix0 = jnp.floor(ix); iy0 = jnp.floor(iy)
    ix1 = ix0 + 1.0;     iy1 = iy0 + 1.0
    wx1 = ix - ix0; wx0 = 1.0 - wx1
    wy1 = iy - iy0; wy0 = 1.0 - wy1

    def gather(py, px):
        valid = (px >= 0) & (px <= W - 1) & (py >= 0) & (py <= W - 1)
        pxc = jnp.clip(px, 0, W - 1).astype(jnp.int32)
        pyc = jnp.clip(py, 0, W - 1).astype(jnp.int32)
        v = x[:, :, pyc, pxc]                                  # (N, C, L, W, W)
        return v * valid[None, None].astype(x.dtype)

    samp = (gather(iy0, ix0) * (wy0 * wx0)[None, None]
            + gather(iy0, ix1) * (wy0 * wx1)[None, None]
            + gather(iy1, ix0) * (wy1 * wx0)[None, None]
            + gather(iy1, ix1) * (wy1 * wx1)[None, None])
    out = samp.sum(axis=3)                                     # sum over rotated rows
    return jnp.swapaxes(out, -1, -2)                           # (N, C, W, L)


if __name__ == "__main__":
    key = jax.random.PRNGKey(0)
    x = jax.random.normal(key, (2, 4, 16, 16), dtype=jnp.float32)   # N=2, C=4, H=W=16
    theta = jnp.arange(180, dtype=jnp.float32)                       # module default

    radon_fn = jax.jit(lambda xx, tt: radon_forward(xx, tt, circle=True))
    out = radon_fn(x, theta)
    out = jax.block_until_ready(out)
    assert out.shape == (2, 4, 16, 180), out.shape

    ref = radon_reference(x, theta)
    err = float(jnp.max(jnp.abs(out - ref)))
    assert err < 1e-3, f"max abs err {err}"

    print("KERNEL_OK")
</pallas_src>

<mosaic_0001>
module attributes {stable_mosaic.version = 11 : i64} {
  func.func @radon_matmul_kernel(%arg0: i32, %arg1: i32, %arg2: memref<8x256xf32, #tpu.memory_space<vmem>>, %arg3: memref<256x512xf32, #tpu.memory_space<vmem>>, %arg4: memref<8x512xf32, #tpu.memory_space<vmem>>, %arg5: memref<8x512xf32, #tpu.memory_space<vmem>>) attributes {dimension_semantics = [#tpu.dimension_semantics<parallel>, #tpu.dimension_semantics<arbitrary>], iteration_bounds = array<i64: 6, 1>, scalar_prefetch = 0 : i64, scratch_operands = 1 : i64, tpu.core_type = #tpu.core_type<tc>, window_params = [{transform_indices = @transform_0, window_bounds = array<i64: 8, 256>}, {transform_indices = @transform_1, window_bounds = array<i64: 256, 512>}, {transform_indices = @transform_2, window_bounds = array<i64: 8, 512>}]} {
    %c0_i32 = arith.constant 0 : i32
    %0 = arith.cmpi eq, %arg1, %c0_i32 : i32
    %1 = arith.extui %0 : i1 to i32
    %c0_i32_0 = arith.constant 0 : i32
    %2 = arith.cmpi ne, %1, %c0_i32_0 : i32
    scf.if %2 {
      %cst_10 = arith.constant 0.000000e+00 : f32
      %12 = vector.broadcast %cst_10 : f32 to vector<8x512xf32>
      %c0_11 = arith.constant 0 : index
      %c0_12 = arith.constant 0 : index
      %13 = vector.load %arg5[%c0_11, %c0_12] : memref<8x512xf32, #tpu.memory_space<vmem>>, vector<8x512xf32>
      tpu.vector_store %arg5[%c0_11, %c0_12], %12 {strides = array<i32>} : memref<8x512xf32, #tpu.memory_space<vmem>>, vector<8x512xf32>,
    } else {
    }
    %c0 = arith.constant 0 : index
    %c0_1 = arith.constant 0 : index
    %3 = vector.load %arg5[%c0, %c0_1] : memref<8x512xf32, #tpu.memory_space<vmem>>, vector<8x512xf32>
    %c0_2 = arith.constant 0 : index
    %c0_3 = arith.constant 0 : index
    %4 = vector.load %arg2[%c0_2, %c0_3] : memref<8x256xf32, #tpu.memory_space<vmem>>, vector<8x256xf32>
    %c0_4 = arith.constant 0 : index
    %c0_5 = arith.constant 0 : index
    %5 = vector.load %arg3[%c0_4, %c0_5] : memref<256x512xf32, #tpu.memory_space<vmem>>, vector<256x512xf32>
    %cst = arith.constant dense<0.000000e+00> : vector<8x512xf32>
    %6 = tpu.matmul %4, %5, %cst {dimension_numbers = #tpu.dot_dimension_numbers<[1], [0], [0], [1], [0, 0, 1, 1], [], []>} : vector<8x256xf32>, vector<256x512xf32>, vector<8x512xf32> -> vector<8x512xf32>
    %7 = arith.addf %3, %6 : vector<8x512xf32>
    %c0_6 = arith.constant 0 : index
    %c0_7 = arith.constant 0 : index
    %8 = vector.load %arg5[%c0_6, %c0_7] : memref<8x512xf32, #tpu.memory_space<vmem>>, vector<8x512xf32>
    tpu.vector_store %arg5[%c0_6, %c0_7], %7 {strides = array<i32>} : memref<8x512xf32, #tpu.memory_space<vmem>>, vector<8x512xf32>,
    %c0_i32_8 = arith.constant 0 : i32
    %9 = arith.cmpi eq, %arg1, %c0_i32_8 : i32
    %10 = arith.extui %9 : i1 to i32
    %c0_i32_9 = arith.constant 0 : i32
    %11 = arith.cmpi ne, %10, %c0_i32_9 : i32
    scf.if %11 {
      %c0_10 = arith.constant 0 : index
      %c0_11 = arith.constant 0 : index
      %12 = vector.load %arg5[%c0_10, %c0_11] : memref<8x512xf32, #tpu.memory_space<vmem>>, vector<8x512xf32>
      %c0_12 = arith.constant 0 : index
      %c0_13 = arith.constant 0 : index
      %13 = vector.load %arg4[%c0_12, %c0_13] : memref<8x512xf32, #tpu.memory_space<vmem>>, vector<8x512xf32>
      tpu.vector_store %arg4[%c0_12, %c0_13], %12 {strides = array<i32>} : memref<8x512xf32, #tpu.memory_space<vmem>>, vector<8x512xf32>,
    } else {
    }
    return
  }
  func.func @transform_0(%arg0: i32, %arg1: i32) -> (i32, i32) {
    %c0_i32 = arith.constant 0 : i32
    %c0_i32_0 = arith.constant 0 : i32
    return %c0_i32, %arg1 : i32, i32
  }
  func.func @transform_1(%arg0: i32, %arg1: i32) -> (i32, i32) {
    %c0_i32 = arith.constant 0 : i32
    return %arg1, %arg0 : i32, i32
  }
  func.func @transform_2(%arg0: i32, %arg1: i32) -> (i32, i32) {
    %c0_i32 = arith.constant 0 : i32
    %c0_i32_0 = arith.constant 0 : i32
    return %c0_i32, %arg0 : i32, i32
  }
}

</mosaic_0001>

<bundles_post_ra>
// kernel: _lambda_.1
= control target key start
LH: loop header
LB: loop body
LE: loop exit
PB: predicated region body
PF: predicated region fallthrough
CT: control target
= control target key end

     0   :  { %s980_s9 = smov 0   ;;  %s982_s10 = smov 0   ;;  %s1441_s0 = inlined_call_operand.vmem [shape: f32[8,256], index: 0, kind: input, shape index: {}]   ;;  %s1442_s1 = inlined_call_operand.vmem [shape: f32[256,3072], index: 1, kind: input, shape index: {}]   ;;  %s1443_s2 = inlined_call_operand.vmem [shape: f32[8,3072], index: 2, kind: output, shape index: {}]  }
   0x1   :  { %s984_s11 = smov 0   ;;  %s986_s12 = smov 0  }
   0x2   :  { %s988_s13 = smov 0  }
   0x3 LB: > { %s24_s14 = sadd.s32 1, %s959_s12  ;;  %p66_p1 = scmp.ne.s32.totalorder %s951_s10, %s947_s9  ;;  %s963_s13 = sphi %s988_s13, %s12_s13   ;;  %s959_s12 = sphi %s986_s12, %s1447_s12   ;;  %s955_s11 = sphi %s984_s11, %s1446_s11   ;;  %s951_s10 = sphi %s982_s10, %s1445_s10   ;;  %s947_s9 = sphi %s980_s9, %s1444_s9  }
   0x4   : > { %p26_p0 = scmp.ge.s32.totalorder %s24_s14, 6  ;;  %p67_p2 = scmp.eq.s32.totalorder %s963_s13, 0 }
   0x5   : > { %s59_s16 = sadd.s32 1, %s951_s10  ;;  %p874_p5 = scmp.ge.s32.totalorder %s963_s13, 6 }
   0x6   : > { %s1449_s14 = smov (%p26_p0, %s24_s14), 0  ;;  %p68_p3 = por %p67_p2, %p66_p1 }
   0x7   : > { %s55_s15 = ssub.s32 %s959_s12, %s1449_s14  ;;  %127 = sbr.rel (%p874_p5) target bundleno = 144 (0x90), region = 20 }
   0x8   : > { %p57_p4 = scmp.eq.s32.totalorder %s55_s15, 0 }
   0xa   : > { %s1015_s17 = scalar_select %p57_p4, %s951_s10, %s59_s16  }
   0xc   : > { %130 = sbr.rel (!%p68_p3) target bundleno = 144 (0x90), region = 24  ;;  %s132_s18 = sand.u32 (%p68_p3), 1, %s951_s10  }
   0xd   : > { %s884_s19 = sshll.u32 (%p68_p3), %s959_s12, 5  ;;  %s875_s20 = sshll.u32 (%p68_p3), %s132_s18, 10 }
   0xe   : > { %s1023_s23 = scalar_lea.vmem (%p68_p3), %s1442_s1, %s884_s19  ;;  %s1028_s24 = scalar_lea.vmem (%p68_p3), [#allocation3], %s875_s20 }
   0xf   : > { %v153_v0 = vld [vmem:[%s1023_s23] sm:$0xff] (%p68_p3)  ;;  %v155_v1 = vld [vmem:[%s1023_s23 + $0x8] sm:$0xff] (%p68_p3)  ;;  %v157_v2 = vld [vmem:[%s1023_s23 + $0x10] sm:$0xff] (%p68_p3) }
  0x10   : > { %154 = vst [vmem:[%s1028_s24] sm:$0xff] (%p68_p3), %v153_v0  ;;  %v159_v3 = vld [vmem:[%s1023_s23 + $0x18] sm:$0xff] (%p68_p3)  ;;  %v161_v4 = vld [vmem:[%s1023_s23 + $0xc0] sm:$0xff] (%p68_p3)  ;;  %v163_v5 = vld [vmem:[%s1023_s23 + $0xc8] sm:$0xff] (%p68_p3) }
  0x11   : > { %156 = vst [vmem:[%s1028_s24 + $0x8] sm:$0xff] %v155_v1  ;;  %v165_v6 = vld [vmem:[%s1023_s23 + $0xd0] sm:$0xff]  ;;  %v167_v7 = vld [vmem:[%s1023_s23 + $0xd8] sm:$0xff]  ;;  %v169_v8 = vld [vmem:[%s1023_s23 + $0x180] sm:$0xff] }
  0x12   : > { %158 = vst [vmem:[%s1028_s24 + $0x10] sm:$0xff] %v157_v2  ;;  %v171_v9 = vld [vmem:[%s1023_s23 + $0x188] sm:$0xff]  ;;  %v173_v10 = vld [vmem:[%s1023_s23 + $0x190] sm:$0xff]  ;;  %v175_v11 = vld [vmem:[%s1023_s23 + $0x198] sm:$0xff] }
  0x13   : > { %160 = vst [vmem:[%s1028_s24 + $0x18] sm:$0xff] %v159_v3  ;;  %v177_v12 = vld [vmem:[%s1023_s23 + $0x240] sm:$0xff]  ;;  %v179_v13 = vld [vmem:[%s1023_s23 + $0x248] sm:$0xff]  ;;  %v181_v14 = vld [vmem:[%s1023_s23 + $0x250] sm:$0xff] }
  0x14   : > { %162 = vst [vmem:[%s1028_s24 + $0x20] sm:$0xff] %v161_v4  ;;  %v183_v15 = vld [vmem:[%s1023_s23 + $0x258] sm:$0xff]  ;;  %v185_v16 = vld [vmem:[%s1023_s23 + $0x300] sm:$0xff]  ;;  %v187_v17 = vld [vmem:[%s1023_s23 + $0x308] sm:$0xff] }
  0x15   : > { %164 = vst [vmem:[%s1028_s24 + $0x28] sm:$0xff] %v163_v5  ;;  %v189_v18 = vld [vmem:[%s1023_s23 + $0x310] sm:$0xff]  ;;  %v191_v19 = vld [vmem:[%s1023_s23 + $0x318] sm:$0xff]  ;;  %v193_v20 = vld [vmem:[%s1023_s23 + $0x3c0] sm:$0xff] }
  0x16   : > { %166 = vst [vmem:[%s1028_s24 + $0x30] sm:$0xff] %v165_v6  ;;  %v195_v21 = vld [vmem:[%s1023_s23 + $0x3c8] sm:$0xff]  ;;  %v197_v22 = vld [vmem:[%s1023_s23 + $0x3d0] sm:$0xff]  ;;  %v199_v23 = vld [vmem:[%s1023_s23 + $0x3d8] sm:$0xff] }
  0x17   : > { %168 = vst [vmem:[%s1028_s24 + $0x38] sm:$0xff] %v167_v7  ;;  %v201_v24 = vld [vmem:[%s1023_s23 + $0x480] sm:$0xff]  ;;  %v203_v25 = vld [vmem:[%s1023_s23 + $0x488] sm:$0xff]  ;;  %v205_v26 = vld [vmem:[%s1023_s23 + $0x490] sm:$0xff] }
  0x18   : > { %170 = vst [vmem:[%s1028_s24 + $0x40] sm:$0xff] %v169_v8  ;;  %v207_v27 = vld [vmem:[%s1023_s23 + $0x498] sm:$0xff]  ;;  %v209_v28 = vld [vmem:[%s1023_s23 + $0x540] sm:$0xff]  ;;  %v211_v29 = vld [vmem:[%s1023_s23 + $0x548] sm:$0xff] }
  0x19   : > { %172 = vst [vmem:[%s1028_s24 + $0x48] sm:$0xff] %v171_v9  ;;  %v213_v30 = vld [vmem:[%s1023_s23 + $0x550] sm:$0xff]  ;;  %v215_v31 = vld [vmem:[%s1023_s23 + $0x558] sm:$0xff]  ;;  %v217_v32 = vld [vmem:[%s1023_s23 + $0x600] sm:$0xff] }
  0x1a   : > { %174 = vst [vmem:[%s1028_s24 + $0x50] sm:$0xff] %v173_v10  ;;  %v219_v33 = vld [vmem:[%s1023_s23 + $0x608] sm:$0xff]  ;;  %v221_v34 = vld [vmem:[%s1023_s23 + $0x610] sm:$0xff]  ;;  %v223_v35 = vld [vmem:[%s1023_s23 + $0x618] sm:$0xff] }
  0x1b   : > { %176 = vst [vmem:[%s1028_s24 + $0x58] sm:$0xff] %v175_v11  ;;  %v225_v36 = vld [vmem:[%s1023_s23 + $0x6c0] sm:$0xff]  ;;  %v227_v37 = vld [vmem:[%s1023_s23 + $0x6c8] sm:$0xff]  ;;  %v229_v38 = vld [vmem:[%s1023_s23 + $0x6d0] sm:$0xff] }
  0x1c   : > { %178 = vst [vmem:[%s1028_s24 + $0x60] sm:$0xff] %v177_v12  ;;  %v231_v39 = vld [vmem:[%s1023_s23 + $0x6d8] sm:$0xff]  ;;  %v233_v40 = vld [vmem:[%s1023_s23 + $0x780] sm:$0xff]  ;;  %v235_v41 = vld [vmem:[%s1023_s23 + $0x788] sm:$0xff] }
  0x1d   : > { %180 = vst [vmem:[%s1028_s24 + $0x68] sm:$0xff] %v179_v13  ;;  %v237_v42 = vld [vmem:[%s1023_s23 + $0x790] sm:$0xff]  ;;  %v239_v43 = vld [vmem:[%s1023_s23 + $0x798] sm:$0xff]  ;;  %v241_v44 = vld [vmem:[%s1023_s23 + $0x840] sm:$0xff] }
  0x1e   : > { %182 = vst [vmem:[%s1028_s24 + $0x70] sm:$0xff] %v181_v14  ;;  %v243_v45 = vld [vmem:[%s1023_s23 + $0x848] sm:$0xff]  ;;  %v245_v46 = vld [vmem:[%s1023_s23 + $0x850] sm:$0xff]  ;;  %v247_v47 = vld [vmem:[%s1023_s23 + $0x858] sm:$0xff] }
  0x1f   : > { %184 = vst [vmem:[%s1028_s24 + $0x78] sm:$0xff] %v183_v15  ;;  %v249_v48 = vld [vmem:[%s1023_s23 + $0x900] sm:$0xff]  ;;  %v251_v49 = vld [vmem:[%s1023_s23 + $0x908] sm:$0xff]  ;;  %v253_v50 = vld [vmem:[%s1023_s23 + $0x910] sm:$0xff] }
  0x20   : > { %186 = vst [vmem:[%s1028_s24 + $0x80] sm:$0xff] %v185_v16  ;;  %v255_v51 = vld [vmem:[%s1023_s23 + $0x918] sm:$0xff]  ;;  %v257_v52 = vld [vmem:[%s1023_s23 + $0x9c0] sm:$0xff]  ;;  %v259_v53 = vld [vmem:[%s1023_s23 + $0x9c8] sm:$0xff] }
  0x21   : > { %188 = vst [vmem:[%s1028_s24 + $0x88] sm:$0xff] %v187_v17  ;;  %v261_v54 = vld [vmem:[%s1023_s23 + $0x9d0] sm:$0xff]  ;;  %v263_v55 = vld [vmem:[%s1023_s23 + $0x9d8] sm:$0xff]  ;;  %v265_v56 = vld [vmem:[%s1023_s23 + $0xa80] sm:$0xff] }
  0x22   : > { %190 = vst [vmem:[%s1028_s24 + $0x90] sm:$0xff] %v189_v18  ;;  %v267_v57 = vld [vmem:[%s1023_s23 + $0xa88] sm:$0xff]  ;;  %v269_v58 = vld [vmem:[%s1023_s23 + $0xa90] sm:$0xff]  ;;  %v271_v59 = vld [vmem:[%s1023_s23 + $0xa98] sm:$0xff] }
  0x23   : > { %192 = vst [vmem:[%s1028_s24 + $0x98] sm:$0xff] %v191_v19  ;;  %v273_v60 = vld [vmem:[%s1023_s23 + $0xb40] sm:$0xff]  ;;  %v275_v61 = vld [vmem:[%s1023_s23 + $0xb48] sm:$0xff]  ;;  %v277_v62 = vld [vmem:[%s1023_s23 + $0xb50] sm:$0xff] }
  0x24   : > { %194 = vst [vmem:[%s1028_s24 + $0xa0] sm:$0xff] %v193_v20  ;;  %v279_v63 = vld [vmem:[%s1023_s23 + $0xb58] sm:$0xff]  ;;  %v281_v0 = vld [vmem:[%s1023_s23 + $0xc00] sm:$0xff]  ;;  %v283_v1 = vld [vmem:[%s1023_s23 + $0xc08] sm:$0xff] }
  0x25   : > { %196 = vst [vmem:[%s1028_s24 + $0xa8] sm:$0xff] %v195_v21  ;;  %v285_v2 = vld [vmem:[%s1023_s23 + $0xc10] sm:$0xff]  ;;  %v287_v3 = vld [vmem:[%s1023_s23 + $0xc18] sm:$0xff]  ;;  %v289_v4 = vld [vmem:[%s1023_s23 + $0xcc0] sm:$0xff] }
  0x26   : > { %198 = vst [vmem:[%s1028_s24 + $0xb0] sm:$0xff] %v197_v22  ;;  %v291_v5 = vld [vmem:[%s1023_s23 + $0xcc8] sm:$0xff]  ;;  %v293_v6 = vld [vmem:[%s1023_s23 + $0xcd0] sm:$0xff]  ;;  %v295_v7 = vld [vmem:[%s1023_s23 + $0xcd8] sm:$0xff] }
  0x27   : > { %200 = vst [vmem:[%s1028_s24 + $0xb8] sm:$0xff] %v199_v23  ;;  %v297_v8 = vld [vmem:[%s1023_s23 + $0xd80] sm:$0xff]  ;;  %v299_v9 = vld [vmem:[%s1023_s23 + $0xd88] sm:$0xff]  ;;  %v301_v10 = vld [vmem:[%s1023_s23 + $0xd90] sm:$0xff] }
  0x28   : > { %202 = vst [vmem:[%s1028_s24 + $0xc0] sm:$0xff] %v201_v24  ;;  %v303_v11 = vld [vmem:[%s1023_s23 + $0xd98] sm:$0xff]  ;;  %v305_v12 = vld [vmem:[%s1023_s23 + $0xe40] sm:$0xff]  ;;  %v307_v13 = vld [vmem:[%s1023_s23 + $0xe48] sm:$0xff] }
  0x29   : > { %204 = vst [vmem:[%s1028_s24 + $0xc8] sm:$0xff] %v203_v25  ;;  %v309_v14 = vld [vmem:[%s1023_s23 + $0xe50] sm:$0xff]  ;;  %v311_v15 = vld [vmem:[%s1023_s23 + $0xe58] sm:$0xff]  ;;  %v313_v16 = vld [vmem:[%s1023_s23 + $0xf00] sm:$0xff] }
  0x2a   : > { %206 = vst [vmem:[%s1028_s24 + $0xd0] sm:$0xff] %v205_v26  ;;  %v315_v17 = vld [vmem:[%s1023_s23 + $0xf08] sm:$0xff]  ;;  %v317_v18 = vld [vmem:[%s1023_s23 + $0xf10] sm:$0xff]  ;;  %v319_v19 = vld [vmem:[%s1023_s23 + $0xf18] sm:$0xff] }
  0x2b   : > { %208 = vst [vmem:[%s1028_s24 + $0xd8] sm:$0xff] %v207_v27  ;;  %v321_v20 = vld [vmem:[%s1023_s23 + $0xfc0] sm:$0xff]  ;;  %v323_v21 = vld [vmem:[%s1023_s23 + $0xfc8] sm:$0xff]  ;;  %v325_v22 = vld [vmem:[%s1023_s23 + $0xfd0] sm:$0xff] }
  0x2c   : > { %210 = vst [vmem:[%s1028_s24 + $0xe0] sm:$0xff] %v209_v28  ;;  %v327_v23 = vld [vmem:[%s1023_s23 + $0xfd8] sm:$0xff]  ;;  %v329_v24 = vld [vmem:[%s1023_s23 + $0x1080] sm:$0xff]  ;;  %v331_v25 = vld [vmem:[%s1023_s23 + $0x1088] sm:$0xff] }
  0x2d   : > { %212 = vst [vmem:[%s1028_s24 + $0xe8] sm:$0xff] %v211_v29  ;;  %v333_v26 = vld [vmem:[%s1023_s23 + $0x1090] sm:$0xff]  ;;  %v335_v27 = vld [vmem:[%s1023_s23 + $0x1098] sm:$0xff]  ;;  %v337_v28 = vld [vmem:[%s1023_s23 + $0x1140] sm:$0xff] }
  0x2e   : > { %214 = vst [vmem:[%s1028_s24 + $0xf0] sm:$0xff] %v213_v30  ;;  %v339_v29 = vld [vmem:[%s1023_s23 + $0x1148] sm:$0xff]  ;;  %v341_v30 = vld [vmem:[%s1023_s23 + $0x1150] sm:$0xff] }
  0x2f   : > { %216 = vst [vmem:[%s1028_s24 + $0xf8] sm:$0xff] %v215_v31  ;;  %v343_v31 = vld [vmem:[%s1023_s23 + $0x1158] sm:$0xff] }
  0x30   : > { %218 = vst [vmem:[%s1028_s24 + $0x100] sm:$0xff] %v217_v32  ;;  %v345_v32 = vld [vmem:[%s1023_s23 + $0x1200] sm:$0xff] }
  0x31   : > { %220 = vst [vmem:[%s1028_s24 + $0x108] sm:$0xff] %v219_v33  ;;  %v347_v33 = vld [vmem:[%s1023_s23 + $0x1208] sm:$0xff] }
  0x32   : > { %222 = vst [vmem:[%s1028_s24 + $0x110] sm:$0xff] %v221_v34  ;;  %v349_v34 = vld [vmem:[%s1023_s23 + $0x1210] sm:$0xff] }
  0x33   : > { %224 = vst [vmem:[%s1028_s24 + $0x118] sm:$0xff] %v223_v35  ;;  %v351_v35 = vld [vmem:[%s1023_s23 + $0x1218] sm:$0xff] }
  0x34   : > { %226 = vst [vmem:[%s1028_s24 + $0x120] sm:$0xff] %v225_v36  ;;  %v353_v36 = vld [vmem:[%s1023_s23 + $0x12c0] sm:$0xff] }
  0x35   : > { %228 = vst [vmem:[%s1028_s24 + $0x128] sm:$0xff] %v227_v37  ;;  %v355_v37 = vld [vmem:[%s1023_s23 + $0x12c8] sm:$0xff] }
  0x36   : > { %230 = vst [vmem:[%s1028_s24 + $0x130] sm:$0xff] %v229_v38  ;;  %v357_v38 = vld [vmem:[%s1023_s23 + $0x12d0] sm:$0xff] }
  0x37   : > { %232 = vst [vmem:[%s1028_s24 + $0x138] sm:$0xff] %v231_v39  ;;  %v359_v39 = vld [vmem:[%s1023_s23 + $0x12d8] sm:$0xff] }
  0x38   : > { %234 = vst [vmem:[%s1028_s24 + $0x140] sm:$0xff] %v233_v40  ;;  %v361_v40 = vld [vmem:[%s1023_s23 + $0x1380] sm:$0xff] }
  0x39   : > { %236 = vst [vmem:[%s1028_s24 + $0x148] sm:$0xff] %v235_v41  ;;  %v363_v41 = vld [vmem:[%s1023_s23 + $0x1388] sm:$0xff] }
  0x3a   : > { %238 = vst [vmem:[%s1028_s24 + $0x150] sm:$0xff] %v237_v42  ;;  %v365_v42 = vld [vmem:[%s1023_s23 + $0x1390] sm:$0xff] }
  0x3b   : > { %240 = vst [vmem:[%s1028_s24 + $0x158] sm:$0xff] %v239_v43  ;;  %v367_v43 = vld [vmem:[%s1023_s23 + $0x1398] sm:$0xff] }
  0x3c   : > { %242 = vst [vmem:[%s1028_s24 + $0x160] sm:$0xff] %v241_v44  ;;  %v369_v44 = vld [vmem:[%s1023_s23 + $0x1440] sm:$0xff] }
  0x3d   : > { %244 = vst [vmem:[%s1028_s24 + $0x168] sm:$0xff] %v243_v45  ;;  %v371_v45 = vld [vmem:[%s1023_s23 + $0x1448] sm:$0xff] }
  0x3e   : > { %246 = vst [vmem:[%s1028_s24 + $0x170] sm:$0xff] %v245_v46  ;;  %v373_v46 = vld [vmem:[%s1023_s23 + $0x1450] sm:$0xff] }
  0x3f   : > { %248 = vst [vmem:[%s1028_s24 + $0x178] sm:$0xff] %v247_v47  ;;  %v375_v47 = vld [vmem:[%s1023_s23 + $0x1458] sm:$0xff] }
  0x40   : > { %250 = vst [vmem:[%s1028_s24 + $0x180] sm:$0xff] %v249_v48  ;;  %v377_v48 = vld [vmem:[%s1023_s23 + $0x1500] sm:$0xff] }
  0x41   : > { %252 = vst [vmem:[%s1028_s24 + $0x188] sm:$0xff] %v251_v49  ;;  %v379_v49 = vld [vmem:[%s1023_s23 + $0x1508] sm:$0xff] }
  0x42   : > { %254 = vst [vmem:[%s1028_s24 + $0x190] sm:$0xff] %v253_v50  ;;  %v381_v50 = vld [vmem:[%s1023_s23 + $0x1510] sm:$0xff] }
  0x43   : > { %256 = vst [vmem:[%s1028_s24 + $0x198] sm:$0xff] %v255_v51  ;;  %v383_v51 = vld [vmem:[%s1023_s23 + $0x1518] sm:$0xff] }
  0x44   : > { %258 = vst [vmem:[%s1028_s24 + $0x1a0] sm:$0xff] %v257_v52  ;;  %v385_v52 = vld [vmem:[%s1023_s23 + $0x15c0] sm:$0xff] }
  0x45   : > { %260 = vst [vmem:[%s1028_s24 + $0x1a8] sm:$0xff] %v259_v53  ;;  %v387_v53 = vld [vmem:[%s1023_s23 + $0x15c8] sm:$0xff] }
  0x46   : > { %262 = vst [vmem:[%s1028_s24 + $0x1b0] sm:$0xff] %v261_v54  ;;  %v389_v54 = vld [vmem:[%s1023_s23 + $0x15d0] sm:$0xff] }
  0x47   : > { %264 = vst [vmem:[%s1028_s24 + $0x1b8] sm:$0xff] %v263_v55  ;;  %v391_v55 = vld [vmem:[%s1023_s23 + $0x15d8] sm:$0xff] }
  0x48   : > { %266 = vst [vmem:[%s1028_s24 + $0x1c0] sm:$0xff] %v265_v56  ;;  %v393_v56 = vld [vmem:[%s1023_s23 + $0x1680] sm:$0xff] }
  0x49   : > { %268 = vst [vmem:[%s1028_s24 + $0x1c8] sm:$0xff] %v267_v57  ;;  %v395_v57 = vld [vmem:[%s1023_s23 + $0x1688] sm:$0xff] }
  0x4a   : > { %270 = vst [vmem:[%s1028_s24 + $0x1d0] sm:$0xff] %v269_v58  ;;  %v397_v58 = vld [vmem:[%s1023_s23 + $0x1690] sm:$0xff] }
  0x4b   : > { %272 = vst [vmem:[%s1028_s24 + $0x1d8] sm:$0xff] %v271_v59  ;;  %v399_v59 = vld [vmem:[%s1023_s23 + $0x1698] sm:$0xff] }
  0x4c   : > { %274 = vst [vmem:[%s1028_s24 + $0x1e0] sm:$0xff] %v273_v60  ;;  %v401_v60 = vld [vmem:[%s1023_s23 + $0x1740] sm:$0xff] }
  0x4d   : > { %276 = vst [vmem:[%s1028_s24 + $0x1e8] sm:$0xff] %v275_v61  ;;  %v403_v61 = vld [vmem:[%s1023_s23 + $0x1748] sm:$0xff] }
  0x4e   : > { %278 = vst [vmem:[%s1028_s24 + $0x1f0] sm:$0xff] %v277_v62  ;;  %v405_v62 = vld [vmem:[%s1023_s23 + $0x1750] sm:$0xff] }
  0x4f   : > { %280 = vst [vmem:[%s1028_s24 + $0x1f8] sm:$0xff] %v279_v63  ;;  %v407_v63 = vld [vmem:[%s1023_s23 + $0x1758] sm:$0xff] }
  0x50   : > { %282 = vst [vmem:[%s1028_s24 + $0x200] sm:$0xff] %v281_v0 }
  0x51   : > { %284 = vst [vmem:[%s1028_s24 + $0x208] sm:$0xff] %v283_v1 }
  0x52   : > { %286 = vst [vmem:[%s1028_s24 + $0x210] sm:$0xff] %v285_v2 }
  0x53   : > { %288 = vst [vmem:[%s1028_s24 + $0x218] sm:$0xff] %v287_v3 }
  0x54   : > { %290 = vst [vmem:[%s1028_s24 + $0x220] sm:$0xff] %v289_v4 }
  0x55   : > { %292 = vst [vmem:[%s1028_s24 + $0x228] sm:$0xff] %v291_v5 }
  0x56   : > { %294 = vst [vmem:[%s1028_s24 + $0x230] sm:$0xff] %v293_v6 }
  0x57   : > { %296 = vst [vmem:[%s1028_s24 + $0x238] sm:$0xff] %v295_v7 }
  0x58   : > { %298 = vst [vmem:[%s1028_s24 + $0x240] sm:$0xff] %v297_v8 }
  0x59   : > { %300 = vst [vmem:[%s1028_s24 + $0x248] sm:$0xff] %v299_v9 }
  0x5a   : > { %302 = vst [vmem:[%s1028_s24 + $0x250] sm:$0xff] %v301_v10 }
  0x5b   : > { %304 = vst [vmem:[%s1028_s24 + $0x258] sm:$0xff] %v303_v11 }
  0x5c   : > { %306 = vst [vmem:[%s1028_s24 + $0x260] sm:$0xff] %v305_v12 }
  0x5d   : > { %308 = vst [vmem:[%s1028_s24 + $0x268] sm:$0xff] %v307_v13 }
  0x5e   : > { %310 = vst [vmem:[%s1028_s24 + $0x270] sm:$0xff] %v309_v14 }
  0x5f   : > { %312 = vst [vmem:[%s1028_s24 + $0x278] sm:$0xff] %v311_v15 }
  0x60   : > { %314 = vst [vmem:[%s1028_s24 + $0x280] sm:$0xff] %v313_v16 }
  0x61   : > { %316 = vst [vmem:[%s1028_s24 + $0x288] sm:$0xff] %v315_v17 }
  0x62   : > { %318 = vst [vmem:[%s1028_s24 + $0x290] sm:$0xff] %v317_v18 }
  0x63   : > { %320 = vst [vmem:[%s1028_s24 + $0x298] sm:$0xff] %v319_v19 }
  0x64   : > { %322 = vst [vmem:[%s1028_s24 + $0x2a0] sm:$0xff] %v321_v20 }
  0x65   : > { %324 = vst [vmem:[%s1028_s24 + $0x2a8] sm:$0xff] %v323_v21 }
  0x66   : > { %326 = vst [vmem:[%s1028_s24 + $0x2b0] sm:$0xff] %v325_v22 }
  0x67   : > { %328 = vst [vmem:[%s1028_s24 + $0x2b8] sm:$0xff] %v327_v23 }
  0x68   : > { %330 = vst [vmem:[%s1028_s24 + $0x2c0] sm:$0xff] %v329_v24 }
  0x69   : > { %332 = vst [vmem:[%s1028_s24 + $0x2c8] sm:$0xff] %v331_v25 }
  0x6a   : > { %334 = vst [vmem:[%s1028_s24 + $0x2d0] sm:$0xff] %v333_v26 }
  0x6b   : > { %336 = vst [vmem:[%s1028_s24 + $0x2d8] sm:$0xff] %v335_v27 }
  0x6c   : > { %338 = vst [vmem:[%s1028_s24 + $0x2e0] sm:$0xff] %v337_v28 }
  0x6d   : > { %340 = vst [vmem:[%s1028_s24 + $0x2e8] sm:$0xff] %v339_v29 }
  0x6e   : > { %342 = vst [vmem:[%s1028_s24 + $0x2f0] sm:$0xff] %v341_v30 }
  0x6f   : > { %344 = vst [vmem:[%s1028_s24 + $0x2f8] sm:$0xff] %v343_v31 }
  0x70   : > { %346 = vst [vmem:[%s1028_s24 + $0x300] sm:$0xff] %v345_v32 }
  0x71   : > { %348 = vst [vmem:[%s1028_s24 + $0x308] sm:$0xff] %v347_v33 }
  0x72   : > { %350 = vst [vmem:[%s1028_s24 + $0x310] sm:$0xff] %v349_v34 }
  0x73   : > { %352 = vst [vmem:[%s1028_s24 + $0x318] sm:$0xff] %v351_v35 }
  0x74   : > { %354 = vst [vmem:[%s1028_s24 + $0x320] sm:$0xff] %v353_v36 }
  0x75   : > { %356 = vst [vmem:[%s1028_s24 + $0x328] sm:$0xff] %v355_v37 }
  0x76   : > { %358 = vst [vmem:[%s1028_s24 + $0x330] sm:$0xff] %v357_v38 }
  0x77   : > { %360 = vst [vmem:[%s1028_s24 + $0x338] sm:$0xff] %v359_v39 }
  0x78   : > { %362 = vst [vmem:[%s1028_s24 + $0x340] sm:$0xff] %v361_v40 }
  0x79   : > { %364 = vst [vmem:[%s1028_s24 + $0x348] sm:$0xff] %v363_v41 }
  0x7a   : > { %366 = vst [vmem:[%s1028_s24 + $0x350] sm:$0xff] %v365_v42 }
  0x7b   : > { %368 = vst [vmem:[%s1028_s24 + $0x358] sm:$0xff] %v367_v43 }
  0x7c   : > { %370 = vst [vmem:[%s1028_s24 + $0x360] sm:$0xff] %v369_v44 }
  0x7d   : > { %372 = vst [vmem:[%s1028_s24 + $0x368] sm:$0xff] %v371_v45 }
  0x7e   : > { %374 = vst [vmem:[%s1028_s24 + $0x370] sm:$0xff] %v373_v46 }
  0x7f   : > { %376 = vst [vmem:[%s1028_s24 + $0x378] sm:$0xff] %v375_v47 }
  0x80   : > { %378 = vst [vmem:[%s1028_s24 + $0x380] sm:$0xff] %v377_v48 }
  0x81   : > { %380 = vst [vmem:[%s1028_s24 + $0x388] sm:$0xff] %v379_v49 }
  0x82   : > { %382 = vst [vmem:[%s1028_s24 + $0x390] sm:$0xff] %v381_v50 }
  0x83   : > { %384 = vst [vmem:[%s1028_s24 + $0x398] sm:$0xff] %v383_v51 }
  0x84   : > { %386 = vst [vmem:[%s1028_s24 + $0x3a0] sm:$0xff] %v385_v52 }
  0x85   : > { %388 = vst [vmem:[%s1028_s24 + $0x3a8] sm:$0xff] %v387_v53 }
  0x86   : > { %390 = vst [vmem:[%s1028_s24 + $0x3b0] sm:$0xff] %v389_v54 }
  0x87   : > { %392 = vst [vmem:[%s1028_s24 + $0x3b8] sm:$0xff] %v391_v55 }
  0x88   : > { %394 = vst [vmem:[%s1028_s24 + $0x3c0] sm:$0xff] %v393_v56 }
  0x89   : > { %396 = vst [vmem:[%s1028_s24 + $0x3c8] sm:$0xff] %v395_v57 }
  0x8a   : > { %398 = vst [vmem:[%s1028_s24 + $0x3d0] sm:$0xff] %v397_v58 }
  0x8b   : > { %400 = vst [vmem:[%s1028_s24 + $0x3d8] sm:$0xff] %v399_v59 }
  0x8c   : > { %402 = vst [vmem:[%s1028_s24 + $0x3e0] sm:$0xff] %v401_v60 }
  0x8d   : > { %404 = vst [vmem:[%s1028_s24 + $0x3e8] sm:$0xff] %v403_v61 }
  0x8e   : > { %406 = vst [vmem:[%s1028_s24 + $0x3f0] sm:$0xff] %v405_v62 }
  0x8f   : > { %408 = vst [vmem:[%s1028_s24 + $0x3f8] sm:$0xff] %v407_v63 }
  0x90 PF: > { %p878_p6 = scmp.ge.s32.totalorder %s963_s13, 1  ;;  %p413_p7 = scmp.lt.s32.totalorder %s963_s13, 7 }
  0x92   : > { %p414_p8 = pnand %p878_p6, %p413_p7 }
  0x93   : > { %s420_s25 = sand.u32 (!%p414_p8), 1, %s947_s9   ;;  %s880_s4 = sshll.u32 (!%p414_p8), %s955_s11, 2 }
  0x94   : > { %417 = sbr.rel (%p414_p8) target bundleno = 353 (0x161), region = 47  ;;  %s879_s26 = sshll.u32 (!%p414_p8), %s420_s25, 10 }
  0x95   : > { %s1286_s27 = scalar_lea.vmem (!%p414_p8), [#allocation3], %s879_s26  ;;  %p455_p9 = scmp.lt.s32.totalorder (!%p414_p8), %s880_s4, 23 }
  0x99   : > { %v535_v0 = vld [vmem:[%s1286_s27 + $0x1e8] sm:$0xff]  ;;  %v534_v6 = vld [vmem:[%s1286_s27 + $0x1e0] sm:$0xff]  ;;  %v537_v60 = vld [vmem:[%s1286_s27 + $0x1f8] sm:$0xff]  ;;  %s1451_s4 = smov (!%p455_p9, %s880_s4), 23 }
  0x9a   : > { %v599_v1 = vld [vmem:[%s1286_s27 + $0x3e8] sm:$0xff]  ;;  %642 = vmatpush.msra.mxu2 %v535_v0  ;;  %v598_v7 = vld [vmem:[%s1286_s27 + $0x3e0] sm:$0xff]  ;;  %602 = vmatpush.msra.mxu0 %v534_v6  ;;  %v601_v61 = vld [vmem:[%s1286_s27 + $0x3f8] sm:$0xff]  ;;  %s881_s5 = sshll.u32 %s1451_s4, 3 }
  0x9b   : > { %v531_v2 = vld [vmem:[%s1286_s27 + $0x1c8] sm:$0xff]  ;;  %662 = vmatpush.msra.mxu3 %v599_v1  ;;  %v530_v8 = vld [vmem:[%s1286_s27 + $0x1c0] sm:$0xff]  ;;  %622 = vmatpush.msra.mxu1 %v598_v7  ;;  %v533_v0 = vld [vmem:[%s1286_s27 + $0x1d8] sm:$0xff]  ;;  %s458_s8 = scalar_lea.vmem %s1443_s2, %s881_s5 }
  0x9c   : > { %v595_v3 = vld [vmem:[%s1286_s27 + $0x3c8] sm:$0xff]  ;;  %643 = vmatpush.msra.mxu2 %v531_v2  ;;  %v594_v9 = vld [vmem:[%s1286_s27 + $0x3c0] sm:$0xff]  ;;  %603 = vmatpush.msra.mxu0 %v530_v8  ;;  %v597_v1 = vld [vmem:[%s1286_s27 + $0x3d8] sm:$0xff] }
  0x9d   : > { %v527_v4 = vld [vmem:[%s1286_s27 + $0x1a8] sm:$0xff]  ;;  %663 = vmatpush.msra.mxu3 %v595_v3  ;;  %v526_v12 = vld [vmem:[%s1286_s27 + $0x1a0] sm:$0xff]  ;;  %623 = vmatpush.msra.mxu1 %v594_v9  ;;  %v536_v6 = vld [vmem:[%s1286_s27 + $0x1f0] sm:$0xff] }
  0x9e   : > { %v591_v5 = vld [vmem:[%s1286_s27 + $0x3a8] sm:$0xff]  ;;  %644 = vmatpush.msra.mxu2 %v527_v4  ;;  %v590_v13 = vld [vmem:[%s1286_s27 + $0x3a0] sm:$0xff]  ;;  %604 = vmatpush.msra.mxu0 %v526_v12  ;;  %v529_v4 = vld [vmem:[%s1286_s27 + $0x1b8] sm:$0xff] }
  0x9f   : > { %v523_v10 = vld [vmem:[%s1286_s27 + $0x188] sm:$0xff]  ;;  %664 = vmatpush.msra.mxu3 %v591_v5  ;;  %v522_v16 = vld [vmem:[%s1286_s27 + $0x180] sm:$0xff]  ;;  %624 = vmatpush.msra.mxu1 %v590_v13  ;;  %v593_v5 = vld [vmem:[%s1286_s27 + $0x3b8] sm:$0xff] }
  0xa0   : > { %v587_v11 = vld [vmem:[%s1286_s27 + $0x388] sm:$0xff]  ;;  %645 = vmatpush.msra.mxu2 %v523_v10  ;;  %v586_v17 = vld [vmem:[%s1286_s27 + $0x380] sm:$0xff]  ;;  %605 = vmatpush.msra.mxu0 %v522_v16  ;;  %v600_v7 = vld [vmem:[%s1286_s27 + $0x3f0] sm:$0xff] }
  0xa1   : > { %v519_v14 = vld [vmem:[%s1286_s27 + $0x168] sm:$0xff]  ;;  %665 = vmatpush.msra.mxu3 %v587_v11  ;;  %v518_v20 = vld [vmem:[%s1286_s27 + $0x160] sm:$0xff]  ;;  %625 = vmatpush.msra.mxu1 %v586_v17  ;;  %v525_v8 = vld [vmem:[%s1286_s27 + $0x198] sm:$0xff] }
  0xa2   : > { %v583_v15 = vld [vmem:[%s1286_s27 + $0x368] sm:$0xff]  ;;  %646 = vmatpush.msra.mxu2 %v519_v14  ;;  %v582_v21 = vld [vmem:[%s1286_s27 + $0x360] sm:$0xff]  ;;  %606 = vmatpush.msra.mxu0 %v518_v20  ;;  %v589_v9 = vld [vmem:[%s1286_s27 + $0x398] sm:$0xff] }
  0xa3   : > { %v515_v18 = vld [vmem:[%s1286_s27 + $0x148] sm:$0xff]  ;;  %666 = vmatpush.msra.mxu3 %v583_v15  ;;  %v514_v24 = vld [vmem:[%s1286_s27 + $0x140] sm:$0xff]  ;;  %626 = vmatpush.msra.mxu1 %v582_v21  ;;  %v532_v10 = vld [vmem:[%s1286_s27 + $0x1d0] sm:$0xff] }
  0xa4   : > { %v579_v19 = vld [vmem:[%s1286_s27 + $0x348] sm:$0xff]  ;;  %647 = vmatpush.msra.mxu2 %v515_v18  ;;  %v578_v25 = vld [vmem:[%s1286_s27 + $0x340] sm:$0xff]  ;;  %607 = vmatpush.msra.mxu0 %v514_v24  ;;  %v596_v11 = vld [vmem:[%s1286_s27 + $0x3d0] sm:$0xff] }
  0xa5   : > { %v511_v22 = vld [vmem:[%s1286_s27 + $0x128] sm:$0xff]  ;;  %667 = vmatpush.msra.mxu3 %v579_v19  ;;  %v510_v28 = vld [vmem:[%s1286_s27 + $0x120] sm:$0xff]  ;;  %627 = vmatpush.msra.mxu1 %v578_v25  ;;  %v521_v12 = vld [vmem:[%s1286_s27 + $0x178] sm:$0xff] }
  0xa6   : > { %v575_v23 = vld [vmem:[%s1286_s27 + $0x328] sm:$0xff]  ;;  %648 = vmatpush.msra.mxu2 %v511_v22  ;;  %v574_v29 = vld [vmem:[%s1286_s27 + $0x320] sm:$0xff]  ;;  %608 = vmatpush.msra.mxu0 %v510_v28  ;;  %v585_v13 = vld [vmem:[%s1286_s27 + $0x378] sm:$0xff] }
  0xa7   : > { %v507_v26 = vld [vmem:[%s1286_s27 + $0x108] sm:$0xff]  ;;  %668 = vmatpush.msra.mxu3 %v575_v23  ;;  %v506_v32 = vld [vmem:[%s1286_s27 + $0x100] sm:$0xff]  ;;  %628 = vmatpush.msra.mxu1 %v574_v29  ;;  %v528_v14 = vld [vmem:[%s1286_s27 + $0x1b0] sm:$0xff] }
  0xa8   : > { %v571_v27 = vld [vmem:[%s1286_s27 + $0x308] sm:$0xff]  ;;  %649 = vmatpush.msra.mxu2 %v507_v26  ;;  %v570_v33 = vld [vmem:[%s1286_s27 + $0x300] sm:$0xff]  ;;  %609 = vmatpush.msra.mxu0 %v506_v32  ;;  %v592_v15 = vld [vmem:[%s1286_s27 + $0x3b0] sm:$0xff] }
  0xa9   : > { %v503_v30 = vld [vmem:[%s1286_s27 + $0xe8] sm:$0xff]  ;;  %669 = vmatpush.msra.mxu3 %v571_v27  ;;  %v502_v36 = vld [vmem:[%s1286_s27 + $0xe0] sm:$0xff]  ;;  %629 = vmatpush.msra.mxu1 %v570_v33  ;;  %v517_v16 = vld [vmem:[%s1286_s27 + $0x158] sm:$0xff] }
  0xaa   : > { %v567_v31 = vld [vmem:[%s1286_s27 + $0x2e8] sm:$0xff]  ;;  %650 = vmatpush.msra.mxu2 %v503_v30  ;;  %v566_v37 = vld [vmem:[%s1286_s27 + $0x2e0] sm:$0xff]  ;;  %610 = vmatpush.msra.mxu0 %v502_v36  ;;  %v581_v17 = vld [vmem:[%s1286_s27 + $0x358] sm:$0xff] }
  0xab   : > { %v499_v34 = vld [vmem:[%s1286_s27 + $0xc8] sm:$0xff]  ;;  %670 = vmatpush.msra.mxu3 %v567_v31  ;;  %v498_v40 = vld [vmem:[%s1286_s27 + $0xc0] sm:$0xff]  ;;  %630 = vmatpush.msra.mxu1 %v566_v37  ;;  %v524_v18 = vld [vmem:[%s1286_s27 + $0x190] sm:$0xff] }
  0xac   : > { %v563_v35 = vld [vmem:[%s1286_s27 + $0x2c8] sm:$0xff]  ;;  %651 = vmatpush.msra.mxu2 %v499_v34  ;;  %v562_v41 = vld [vmem:[%s1286_s27 + $0x2c0] sm:$0xff]  ;;  %611 = vmatpush.msra.mxu0 %v498_v40  ;;  %v588_v19 = vld [vmem:[%s1286_s27 + $0x390] sm:$0xff] }
  0xad   : > { %v495_v38 = vld [vmem:[%s1286_s27 + $0xa8] sm:$0xff]  ;;  %671 = vmatpush.msra.mxu3 %v563_v35  ;;  %v494_v44 = vld [vmem:[%s1286_s27 + $0xa0] sm:$0xff]  ;;  %631 = vmatpush.msra.mxu1 %v562_v41  ;;  %v513_v20 = vld [vmem:[%s1286_s27 + $0x138] sm:$0xff] }
  0xae   : > { %v559_v39 = vld [vmem:[%s1286_s27 + $0x2a8] sm:$0xff]  ;;  %652 = vmatpush.msra.mxu2 %v495_v38  ;;  %v558_v45 = vld [vmem:[%s1286_s27 + $0x2a0] sm:$0xff]  ;;  %612 = vmatpush.msra.mxu0 %v494_v44  ;;  %v577_v21 = vld [vmem:[%s1286_s27 + $0x338] sm:$0xff] }
  0xaf   : > { %v491_v42 = vld [vmem:[%s1286_s27 + $0x88] sm:$0xff]  ;;  %672 = vmatpush.msra.mxu3 %v559_v39  ;;  %v490_v48 = vld [vmem:[%s1286_s27 + $0x80] sm:$0xff]  ;;  %632 = vmatpush.msra.mxu1 %v558_v45  ;;  %v520_v22 = vld [vmem:[%s1286_s27 + $0x170] sm:$0xff] }
  0xb0   : > { %v555_v43 = vld [vmem:[%s1286_s27 + $0x288] sm:$0xff]  ;;  %653 = vmatpush.msra.mxu2 %v491_v42  ;;  %v554_v49 = vld [vmem:[%s1286_s27 + $0x280] sm:$0xff]  ;;  %613 = vmatpush.msra.mxu0 %v490_v48  ;;  %v584_v23 = vld [vmem:[%s1286_s27 + $0x370] sm:$0xff] }
  0xb1   : > { %v487_v46 = vld [vmem:[%s1286_s27 + $0x68] sm:$0xff]  ;;  %673 = vmatpush.msra.mxu3 %v555_v43  ;;  %v486_v52 = vld [vmem:[%s1286_s27 + $0x60] sm:$0xff]  ;;  %633 = vmatpush.msra.mxu1 %v554_v49  ;;  %v509_v24 = vld [vmem:[%s1286_s27 + $0x118] sm:$0xff] }
  0xb2   : > { %v551_v47 = vld [vmem:[%s1286_s27 + $0x268] sm:$0xff]  ;;  %654 = vmatpush.msra.mxu2 %v487_v46  ;;  %v550_v53 = vld [vmem:[%s1286_s27 + $0x260] sm:$0xff]  ;;  %614 = vmatpush.msra.mxu0 %v486_v52  ;;  %v573_v25 = vld [vmem:[%s1286_s27 + $0x318] sm:$0xff] }
  0xb3   : > { %v483_v50 = vld [vmem:[%s1286_s27 + $0x48] sm:$0xff]  ;;  %674 = vmatpush.msra.mxu3 %v551_v47  ;;  %v482_v56 = vld [vmem:[%s1286_s27 + $0x40] sm:$0xff]  ;;  %634 = vmatpush.msra.mxu1 %v550_v53  ;;  %v516_v26 = vld [vmem:[%s1286_s27 + $0x150] sm:$0xff] }
  0xb4   : > { %v547_v51 = vld [vmem:[%s1286_s27 + $0x248] sm:$0xff]  ;;  %655 = vmatpush.msra.mxu2 %v483_v50  ;;  %v546_v57 = vld [vmem:[%s1286_s27 + $0x240] sm:$0xff]  ;;  %615 = vmatpush.msra.mxu0 %v482_v56  ;;  %v580_v27 = vld [vmem:[%s1286_s27 + $0x350] sm:$0xff] }
  0xb5   : > { %v479_v54 = vld [vmem:[%s1286_s27 + $0x28] sm:$0xff]  ;;  %675 = vmatpush.msra.mxu3 %v547_v51  ;;  %635 = vmatpush.msra.mxu1 %v546_v57  ;;  %v478_v62 = vld [vmem:[%s1286_s27 + $0x20] sm:$0xff]  ;;  %v505_v28 = vld [vmem:[%s1286_s27 + $0xf8] sm:$0xff] }
  0xb6   : > { %v543_v55 = vld [vmem:[%s1286_s27 + $0x228] sm:$0xff]  ;;  %656 = vmatpush.msra.mxu2 %v479_v54  ;;  %v542_v63 = vld [vmem:[%s1286_s27 + $0x220] sm:$0xff]  ;;  %616 = vmatpush.msra.mxu0 %v478_v62  ;;  %v569_v29 = vld [vmem:[%s1286_s27 + $0x2f8] sm:$0xff] }
  0xb7   : > { %v475_v58 = vld [vmem:[%s1286_s27 + $0x8] sm:$0xff]  ;;  %676 = vmatpush.msra.mxu3 %v543_v55  ;;  %v474_v2 = vld [vmem:[%s1286_s27] sm:$0xff]  ;;  %636 = vmatpush.msra.mxu1 %v542_v63  ;;  %v512_v30 = vld [vmem:[%s1286_s27 + $0x130] sm:$0xff] }
  0xb8   : > { %v539_v59 = vld [vmem:[%s1286_s27 + $0x208] sm:$0xff]  ;;  %657 = vmatpush.msra.mxu2 %v475_v58  ;;  %v538_v3 = vld [vmem:[%s1286_s27 + $0x200] sm:$0xff]  ;;  %617 = vmatpush.msra.mxu0 %v474_v2  ;;  %v576_v31 = vld [vmem:[%s1286_s27 + $0x330] sm:$0xff] }
  0xb9   : > { %677 = vmatpush.msra.mxu3 %v539_v59  ;;  %637 = vmatpush.msra.mxu1 %v538_v3  ;;  %v501_v32 = vld [vmem:[%s1286_s27 + $0xd8] sm:$0xff]  ;;  %v508_v34 = vld [vmem:[%s1286_s27 + $0x110] sm:$0xff]  ;;  %v472_v42 = vld [vmem:[%s1441_s0] sm:$0xff] }
  0xba   : > { %722 = vmatpush.msrb.mxu2 %v537_v60  ;;  %682 = vmatpush.msrb.mxu0 %v536_v6  ;;  %v565_v33 = vld [vmem:[%s1286_s27 + $0x2d8] sm:$0xff]  ;;  %v572_v35 = vld [vmem:[%s1286_s27 + $0x310] sm:$0xff]  ;;  %v473_v43 = vld [vmem:[%s1441_s0 + $0x8] sm:$0xff] }
  0xbb   : > { %742 = vmatpush.msrb.mxu3 %v601_v61  ;;  %702 = vmatpush.msrb.mxu1 %v600_v7  ;;  %v497_v36 = vld [vmem:[%s1286_s27 + $0xb8] sm:$0xff]  ;;  %v504_v38 = vld [vmem:[%s1286_s27 + $0xf0] sm:$0xff] }
  0xbc   : > { %723 = vmatpush.msrb.mxu2 %v533_v0  ;;  %683 = vmatpush.msrb.mxu0 %v532_v10  ;;  %v561_v37 = vld [vmem:[%s1286_s27 + $0x2b8] sm:$0xff]  ;;  %v568_v39 = vld [vmem:[%s1286_s27 + $0x2f0] sm:$0xff] }
  0xbd   : > { %743 = vmatpush.msrb.mxu3 %v597_v1  ;;  %703 = vmatpush.msrb.mxu1 %v596_v11  ;;  %v493_v40 = vld [vmem:[%s1286_s27 + $0x98] sm:$0xff]  ;;  %v500_v44 = vld [vmem:[%s1286_s27 + $0xd0] sm:$0xff] }
  0xbe   : > { %724 = vmatpush.msrb.mxu2 %v529_v4  ;;  %684 = vmatpush.msrb.mxu0 %v528_v14  ;;  %v557_v41 = vld [vmem:[%s1286_s27 + $0x298] sm:$0xff]  ;;  %v564_v45 = vld [vmem:[%s1286_s27 + $0x2d0] sm:$0xff] }
  0xbf   : > { %744 = vmatpush.msrb.mxu3 %v593_v5  ;;  %704 = vmatpush.msrb.mxu1 %v592_v15  ;;  %v489_v46 = vld [vmem:[%s1286_s27 + $0x78] sm:$0xff]  ;;  %v496_v48 = vld [vmem:[%s1286_s27 + $0xb0] sm:$0xff] }
  0xc0   : > { %725 = vmatpush.msrb.mxu2 %v525_v8  ;;  %685 = vmatpush.msrb.mxu0 %v524_v18  ;;  %v553_v47 = vld [vmem:[%s1286_s27 + $0x278] sm:$0xff]  ;;  %v560_v49 = vld [vmem:[%s1286_s27 + $0x2b0] sm:$0xff] }
  0xc1   : > { %745 = vmatpush.msrb.mxu3 %v589_v9  ;;  %705 = vmatpush.msrb.mxu1 %v588_v19  ;;  %v485_v50 = vld [vmem:[%s1286_s27 + $0x58] sm:$0xff]  ;;  %v492_v52 = vld [vmem:[%s1286_s27 + $0x90] sm:$0xff] }
  0xc2   : > { %726 = vmatpush.msrb.mxu2 %v521_v12  ;;  %686 = vmatpush.msrb.mxu0 %v520_v22  ;;  %v549_v51 = vld [vmem:[%s1286_s27 + $0x258] sm:$0xff]  ;;  %v556_v53 = vld [vmem:[%s1286_s27 + $0x290] sm:$0xff] }
  0xc3   : > { %746 = vmatpush.msrb.mxu3 %v585_v13  ;;  %706 = vmatpush.msrb.mxu1 %v584_v23  ;;  %v481_v54 = vld [vmem:[%s1286_s27 + $0x38] sm:$0xff]  ;;  %v488_v56 = vld [vmem:[%s1286_s27 + $0x70] sm:$0xff] }
  0xc4   : > { %727 = vmatpush.msrb.mxu2 %v517_v16  ;;  %687 = vmatpush.msrb.mxu0 %v516_v26  ;;  %v545_v55 = vld [vmem:[%s1286_s27 + $0x238] sm:$0xff]  ;;  %v552_v57 = vld [vmem:[%s1286_s27 + $0x270] sm:$0xff] }
  0xc5   : > { %747 = vmatpush.msrb.mxu3 %v581_v17  ;;  %707 = vmatpush.msrb.mxu1 %v580_v27  ;;  %v477_v58 = vld [vmem:[%s1286_s27 + $0x18] sm:$0xff]  ;;  %v484_v60 = vld [vmem:[%s1286_s27 + $0x50] sm:$0xff] }
  0xc6   : > { %728 = vmatpush.msrb.mxu2 %v513_v20  ;;  %688 = vmatpush.msrb.mxu0 %v512_v30  ;;  %v541_v59 = vld [vmem:[%s1286_s27 + $0x218] sm:$0xff]  ;;  %v548_v61 = vld [vmem:[%s1286_s27 + $0x250] sm:$0xff] }
  0xc7   : > { %748 = vmatpush.msrb.mxu3 %v577_v21  ;;  %708 = vmatpush.msrb.mxu1 %v576_v31  ;;  %v480_v62 = vld [vmem:[%s1286_s27 + $0x30] sm:$0xff] }
  0xc8   : > { %729 = vmatpush.msrb.mxu2 %v509_v24  ;;  %689 = vmatpush.msrb.mxu0 %v508_v34  ;;  %v544_v63 = vld [vmem:[%s1286_s27 + $0x230] sm:$0xff] }
  0xc9   : > { %749 = vmatpush.msrb.mxu3 %v573_v25  ;;  %709 = vmatpush.msrb.mxu1 %v572_v35  ;;  %v476_v0 = vld [vmem:[%s1286_s27 + $0x10] sm:$0xff] }
  0xca   : > { %730 = vmatpush.msrb.mxu2 %v505_v28  ;;  %690 = vmatpush.msrb.mxu0 %v504_v38  ;;  %v540_v1 = vld [vmem:[%s1286_s27 + $0x210] sm:$0xff] }
  0xcb   : > { %750 = vmatpush.msrb.mxu3 %v569_v29  ;;  %710 = vmatpush.msrb.mxu1 %v568_v39 }
  0xcc   : > { %731 = vmatpush.msrb.mxu2 %v501_v32  ;;  %678 = vmatmul.f32.vlgmr.msra.gmra.mxu3 %v473_v43 }
  0xcd   : > { %751 = vmatpush.msrb.mxu3 %v565_v33  ;;  %658 = vmatmul.f32.vlgmr.msra.gmra.mxu2 %v472_v42 }
  0xce   : > { %732 = vmatpush.msrb.mxu2 %v497_v36  ;;  %691 = vmatpush.msrb.mxu0 %v500_v44 }
  0xcf   : > { %752 = vmatpush.msrb.mxu3 %v561_v37  ;;  %711 = vmatpush.msrb.mxu1 %v564_v45 }
  0xd0   : > { %733 = vmatpush.msrb.mxu2 %v493_v40  ;;  %692 = vmatpush.msrb.mxu0 %v496_v48 }
  0xd1   : > { %753 = vmatpush.msrb.mxu3 %v557_v41  ;;  %712 = vmatpush.msrb.mxu1 %v560_v49 }
  0xd2   : > { %734 = vmatpush.msrb.mxu2 %v489_v46  ;;  %693 = vmatpush.msrb.mxu0 %v492_v52 }
  0xd3   : > { %754 = vmatpush.msrb.mxu3 %v553_v47  ;;  %713 = vmatpush.msrb.mxu1 %v556_v53 }
  0xd4   : > { %735 = vmatpush.msrb.mxu2 %v485_v50  ;;  %618 = vmatmul.f32.vlgmr.msra.gmra.mxu0 %v472_v42 }
  0xd5   : > { %755 = vmatpush.msrb.mxu3 %v549_v51  ;;  %638 = vmatmul.f32.vlgmr.msra.gmra.mxu1 %v473_v43 }
  0xd6   : > { %736 = vmatpush.msrb.mxu2 %v481_v54  ;;  %694 = vmatpush.msrb.mxu0 %v488_v56 }
  0xd7   : > { %756 = vmatpush.msrb.mxu3 %v545_v55  ;;  %714 = vmatpush.msrb.mxu1 %v552_v57 }
  0xd8   : > { %737 = vmatpush.msrb.mxu2 %v477_v58  ;;  %695 = vmatpush.msrb.mxu0 %v484_v60 }
  0xd9   : > { %757 = vmatpush.msrb.mxu3 %v541_v59  ;;  %738 = vmatmul.f32.vlgmr.msrb.gmra.mxu2 %v472_v42 }
  0xda   : > { %758 = vmatmul.f32.vlgmr.msrb.gmra.mxu3 %v473_v43  ;;  %715 = vmatpush.msrb.mxu1 %v548_v61 }
  0xdb   : > { %696 = vmatpush.msrb.mxu0 %v480_v62 }
  0xdc   : > { %716 = vmatpush.msrb.mxu1 %v544_v63 }
  0xdd   : > { %697 = vmatpush.msrb.mxu0 %v476_v0 }
  0xde   : > { %717 = vmatpush.msrb.mxu1 %v540_v1  ;;  %698 = vmatmul.f32.vlgmr.msrb.gmra.mxu0 %v472_v42 }
  0xdf   : > { %718 = vmatmul.f32.vlgmr.msrb.gmra.mxu1 %v473_v43 }
 0x14f   : > { %v679_v3 = vpop.f32.mrf.mxu3 }
 0x150   : > { %v659_v2 = vpop.f32.mrf.mxu2 }
 0x151   : > { %v619_v4 = vpop.f32.mrf.mxu0  ;;  %v680_v6 = vadd.f32 %v679_v3, %v659_v2 }
 0x152   : > { %v639_v5 = vpop.f32.mrf.mxu1 }
 0x153   : > { %v640_v7 = vadd.f32 %v639_v5, %v619_v4  ;;  %778 = vst [vmem:[%s458_s8 + $0x8] sm:$0xff] %v680_v6 }
 0x155   : > { %777 = vst [vmem:[%s458_s8] sm:$0xff] %v640_v7 }
 0x15b   : > { %v699_v8 = vpop.f32.mrf.mxu0 }
 0x15c   : > { %v719_v9 = vpop.f32.mrf.mxu1  ;;  %v739_v11 = vpop.f32.mrf.mxu2 }
 0x15d   : > { %v720_v10 = vadd.f32 %v719_v9, %v699_v8  ;;  %v759_v12 = vpop.f32.mrf.mxu3 }
 0x15e   : > { %v760_v13 = vadd.f32 %v759_v12, %v739_v11 }
 0x15f   : > { %779 = vst [vmem:[%s458_s8 + $0x10] sm:$0xff] %v720_v10 }
 0x160   : > { %780 = vst [vmem:[%s458_s8 + $0x18] sm:$0xff] %v760_v13 }
 0x161 PF: > { %s12_s13 = sadd.s32 1, %s963_s13   ;;  %s1444_s9 = smov %s951_s10 }
 0x162   : > { %p9_p10 = scmp.ge.s32.totalorder %s12_s13, 8   ;;  %s1445_s10 = smov %s1015_s17 }
 0x163   : > { %s1446_s11 = smov %s959_s12  ;;  %s1447_s12 = smov %s1449_s14 }
 0x164   :  { %11 = sbr.rel (!%p9_p10) target bundleno = 3 (0x3), region = 97 }

</bundles_post_ra>
